<compile_context>
chip_gen: v7x
topology: tpu7x:2x2x1
jax: 0.10.0
libtpu: 0.0.40
codegen_flags: <defaults>
</compile_context>

<pallas_src>
import math
import jax
import jax.numpy as jnp
from jax.experimental import pallas as pl
from jax.experimental.pallas import tpu as pltpu

# ---- model hyper-parameters (ConsynConfig) -----------------------------------
B, S, H = 2, 8, 32          # batch, seq_len, hidden_size
NUM_HEADS = 4
HEAD_DIM = H // NUM_HEADS
INTERMEDIATE = 64           # intermediate_size
EPS = 1e-5                  # layer_norm_eps
SCALE = 1.0 / math.sqrt(HEAD_DIM)
PACK_W = 3 * H              # width of the packed small-param array (96)


def _layer_norm(x, gamma, beta):
    mean = jnp.mean(x, axis=-1, keepdims=True)
    var = jnp.mean((x - mean) ** 2, axis=-1, keepdims=True)
    return (x - mean) * jax.lax.rsqrt(var + EPS) * gamma + beta


def consyn_layer_kernel(x_ref, wqkv_ref, wo_ref, w1_ref, w2_ref, vec_ref,
                        out_ref, ctx_ref):
    x = x_ref[...].astype(jnp.float32)                      # (B*S, H)

    # ---- unpack the small parameters (static slices, no data movement) -------
    b_qkv = vec_ref[0:1, :3 * H]                            # (1, 3H)
    b1    = vec_ref[1:2, :INTERMEDIATE]                     # (1, I)
    g1    = vec_ref[2:3, :H]
    be1   = vec_ref[3:4, :H]
    g2    = vec_ref[4:5, :H]
    be2   = vec_ref[5:6, :H]
    bo    = vec_ref[6:7, :H]
    b2    = vec_ref[7:8, :H]

    # ---- ln_1 ----------------------------------------------------------------
    h = _layer_norm(x, g1, be1)                             # (B*S, H)

    # ---- fused Q/K/V projection (one MXU push) -------------------------------
    qkv = jnp.dot(h, wqkv_ref[...],
                  preferred_element_type=jnp.float32) + b_qkv   # (B*S, 3H)

    # ---- self attention: static loop over batch & head, 2-D slices only ------
    for b in range(B):
        rows = slice(b * S, (b + 1) * S)
        q_b = qkv[rows, 0:H]                                # (S, H)
        k_b = qkv[rows, H:2 * H]
        v_b = qkv[rows, 2 * H:3 * H]
        for n in range(NUM_HEADS):
            cols = slice(n * HEAD_DIM, (n + 1) * HEAD_DIM)
            qh = q_b[:, cols]                               # (S, dh)
            kh = k_b[:, cols]
            vh = v_b[:, cols]
            sc = jnp.dot(qh, kh.T,
                         preferred_element_type=jnp.float32) * SCALE   # (S, S)
            sc = sc - jnp.max(sc, axis=-1, keepdims=True)
            p = jnp.exp(sc)
            # approx=False keeps the 1e-4 tolerance; approx=True (EUP vrcp) is
            # available with a looser (~1e-3) tolerance.
            p = p * pl.reciprocal(jnp.sum(p, axis=-1, keepdims=True),
                                  approx=False)
            ctx_ref[rows, cols] = jnp.dot(p, vh,
                                          preferred_element_type=jnp.float32)

    ctx = ctx_ref[...]                                      # (B*S, H)
    attn_out = jnp.dot(ctx, wo_ref[...],
                       preferred_element_type=jnp.float32) + bo

    # ---- residual 1 ----------------------------------------------------------
    x2 = x + attn_out

    # ---- ln_2 + MLP ----------------------------------------------------------
    h2 = _layer_norm(x2, g2, be2)
    inter = jnp.dot(h2, w1_ref[...],
                    preferred_element_type=jnp.float32) + b1
    inter = jax.nn.gelu(inter, approximate=True)            # gelu (tanh approx)
    mlp_out = jnp.dot(inter, w2_ref[...],
                      preferred_element_type=jnp.float32) + b2

    # ---- residual 2 ----------------------------------------------------------
    out_ref[...] = (x2 + mlp_out).astype(out_ref.dtype)


def consyn_layer(x, params):
    """x: (B, S, H) float32. params: the 16 per-tensor weights (see main)."""
    (wq, bq, wk, bk, wv, bv, wo, bo,
     g1, be1, g2, be2, w1, b1, w2, b2) = params

    # -- fuse / pack parameters in the wrapper (traced once under jit) ---------
    w_qkv = jnp.concatenate([wq, wk, wv], axis=1)           # (H, 3H)
    b_qkv = jnp.concatenate([bq, bk, bv], axis=1)           # (1, 3H)

    def row(v):
        v = v.reshape(1, -1)
        return jnp.pad(v, ((0, 0), (0, PACK_W - v.shape[1])))

    vec_pack = jnp.concatenate(
        [row(b_qkv), row(b1), row(g1), row(be1),
         row(g2), row(be2), row(bo), row(b2)], axis=0)      # (8, 96)

    x2d = x.reshape(B * S, H)                               # single 2-D slab

    # NOTE(v7x): with a realistic batch, keep a leading "parallel" batch axis
    # so both TensorCores are used; at B=2/S=8 the single-step grid wins.
    out2d = pl.pallas_call(
        consyn_layer_kernel,
        out_shape=jax.ShapeDtypeStruct((B * S, H), jnp.float32),
        grid_spec=pltpu.PrefetchScalarGridSpec(
            num_scalar_prefetch=0,
            grid=(1,),
            in_specs=[
                pl.BlockSpec((B * S, H), lambda i: (0, 0)),
                pl.BlockSpec((H, 3 * H), lambda i: (0, 0)),
                pl.BlockSpec((H, H), lambda i: (0, 0)),
                pl.BlockSpec((H, INTERMEDIATE), lambda i: (0, 0)),
                pl.BlockSpec((INTERMEDIATE, H), lambda i: (0, 0)),
                pl.BlockSpec((8, PACK_W), lambda i: (0, 0)),
            ],
            out_specs=pl.BlockSpec((B * S, H), lambda i: (0, 0)),
            scratch_shapes=[pltpu.VMEM((B * S, H), jnp.float32)],
        ),
        compiler_params=pltpu.CompilerParams(
            dimension_semantics=("arbitrary",)),
    )(x2d, w_qkv, wo, w1, w2, vec_pack)

    return out2d.reshape(B, S, H)


# ---- pure-JAX reference (same math) ------------------------------------------
def consyn_layer_ref(x, params):
    (wq, bq, wk, bk, wv, bv, wo, bo,
     g1, be1, g2, be2, w1, b1, w2, b2) = params

    def ln(z, g, b):
        m = jnp.mean(z, axis=-1, keepdims=True)
        v = jnp.mean((z - m) ** 2, axis=-1, keepdims=True)
        return (z - m) / jnp.sqrt(v + EPS) * g + b

    h = ln(x, g1, be1)
    q = (h @ wq + bq).reshape(B, S, NUM_HEADS, HEAD_DIM)
    k = (h @ wk + bk).reshape(B, S, NUM_HEADS, HEAD_DIM)
    v = (h @ wv + bv).reshape(B, S, NUM_HEADS, HEAD_DIM)
    scores = jnp.einsum('bqnd,bknd->bnqk', q, k) * SCALE
    probs = jax.nn.softmax(scores, axis=-1)
    ctx = jnp.einsum('bnqk,bknd->bqnd', probs, v).reshape(B, S, H)
    attn_out = ctx @ wo + bo
    x2 = x + attn_out
    h2 = ln(x2, g2, be2)
    mlp = jax.nn.gelu(h2 @ w1 + b1, approximate=True) @ w2 + b2
    return x2 + mlp


if __name__ == "__main__":
    key = jax.random.PRNGKey(0)
    ks = jax.random.split(key, 8)

    def dense(k, fan_in, fan_out):
        return 0.02 * jax.random.normal(k, (fan_in, fan_out), jnp.float32)

    x = jax.random.normal(ks[0], (B, S, H), jnp.float32)

    wq = dense(ks[1], H, H)
    wk = dense(ks[2], H, H)
    wv = dense(ks[3], H, H)
    wo = dense(ks[4], H, H)
    bq = jnp.zeros((1, H), jnp.float32)
    bk = jnp.zeros((1, H), jnp.float32)
    bv = jnp.zeros((1, H), jnp.float32)
    bo = jnp.zeros((1, H), jnp.float32)

    g1 = jnp.ones((1, H), jnp.float32)
    be1 = jnp.zeros((1, H), jnp.float32)
    g2 = jnp.ones((1, H), jnp.float32)
    be2 = jnp.zeros((1, H), jnp.float32)

    w1 = dense(ks[5], H, INTERMEDIATE)
    b1 = jnp.zeros((1, INTERMEDIATE), jnp.float32)
    w2 = dense(ks[6], INTERMEDIATE, H)
    b2 = jnp.zeros((1, H), jnp.float32)

    params = [wq, bq, wk, bk, wv, bv, wo, bo,
              g1, be1, g2, be2, w1, b1, w2, b2]

    out = consyn_layer(x, params)
    out = jax.block_until_ready(out)

    ref = consyn_layer_ref(x, params)
    assert out.shape == (B, S, H)
    assert jnp.allclose(out, ref, atol=1e-4, rtol=1e-4), "mismatch vs reference"

    print("KERNEL_OK")
</pallas_src>

<mosaic_0001>
module attributes {stable_mosaic.version = 11 : i64} {
  func.func @consyn_layer_kernel(%arg0: i32, %arg1: memref<16x32xf32, #tpu.memory_space<vmem>>, %arg2: memref<32x96xf32, #tpu.memory_space<vmem>>, %arg3: memref<32x32xf32, #tpu.memory_space<vmem>>, %arg4: memref<32x64xf32, #tpu.memory_space<vmem>>, %arg5: memref<64x32xf32, #tpu.memory_space<vmem>>, %arg6: memref<8x96xf32, #tpu.memory_space<vmem>>, %arg7: memref<16x32xf32, #tpu.memory_space<vmem>>, %arg8: memref<16x32xf32, #tpu.memory_space<vmem>>) attributes {dimension_semantics = [#tpu.dimension_semantics<arbitrary>], iteration_bounds = array<i64: 1>, scalar_prefetch = 0 : i64, scratch_operands = 1 : i64, tpu.core_type = #tpu.core_type<tc>, window_params = [{pipeline_mode = #tpu.pipeline_mode<synchronous>, transform_indices = @transform_0, window_bounds = array<i64: 16, 32>}, {pipeline_mode = #tpu.pipeline_mode<synchronous>, transform_indices = @transform_1, window_bounds = array<i64: 32, 96>}, {pipeline_mode = #tpu.pipeline_mode<synchronous>, transform_indices = @transform_2, window_bounds = array<i64: 32, 32>}, {pipeline_mode = #tpu.pipeline_mode<synchronous>, transform_indices = @transform_3, window_bounds = array<i64: 32, 64>}, {pipeline_mode = #tpu.pipeline_mode<synchronous>, transform_indices = @transform_4, window_bounds = array<i64: 64, 32>}, {pipeline_mode = #tpu.pipeline_mode<synchronous>, transform_indices = @transform_5, window_bounds = array<i64: 8, 96>}, {pipeline_mode = #tpu.pipeline_mode<synchronous>, transform_indices = @transform_6, window_bounds = array<i64: 16, 32>}]} {
    %c0 = arith.constant 0 : index
    %c0_0 = arith.constant 0 : index
    %0 = vector.load %arg1[%c0, %c0_0] : memref<16x32xf32, #tpu.memory_space<vmem>>, vector<16x32xf32>
    %c0_1 = arith.constant 0 : index
    %c0_2 = arith.constant 0 : index
    %1 = vector.load %arg6[%c0_1, %c0_2] : memref<8x96xf32, #tpu.memory_space<vmem>>, vector<1x96xf32>
    %c1 = arith.constant 1 : index
    %c0_3 = arith.constant 0 : index
    %2 = vector.load %arg6[%c1, %c0_3] : memref<8x96xf32, #tpu.memory_space<vmem>>, vector<1x64xf32>
    %c2 = arith.constant 2 : index
    %c0_4 = arith.constant 0 : index
    %3 = vector.load %arg6[%c2, %c0_4] : memref<8x96xf32, #tpu.memory_space<vmem>>, vector<1x32xf32>
    %c3 = arith.constant 3 : index
    %c0_5 = arith.constant 0 : index
    %4 = vector.load %arg6[%c3, %c0_5] : memref<8x96xf32, #tpu.memory_space<vmem>>, vector<1x32xf32>
    %c4 = arith.constant 4 : index
    %c0_6 = arith.constant 0 : index
    %5 = vector.load %arg6[%c4, %c0_6] : memref<8x96xf32, #tpu.memory_space<vmem>>, vector<1x32xf32>
    %c5 = arith.constant 5 : index
    %c0_7 = arith.constant 0 : index
    %6 = vector.load %arg6[%c5, %c0_7] : memref<8x96xf32, #tpu.memory_space<vmem>>, vector<1x32xf32>
    %c6 = arith.constant 6 : index
    %c0_8 = arith.constant 0 : index
    %7 = vector.load %arg6[%c6, %c0_8] : memref<8x96xf32, #tpu.memory_space<vmem>>, vector<1x32xf32>
    %c7 = arith.constant 7 : index
    %c0_9 = arith.constant 0 : index
    %8 = vector.load %arg6[%c7, %c0_9] : memref<8x96xf32, #tpu.memory_space<vmem>>, vector<1x32xf32>
    %cst = arith.constant dense<0.000000e+00> : vector<16xf32>
    %9 = vector.multi_reduction <add>, %0, %cst [1] : vector<16x32xf32> to vector<16xf32>
    %10 = vector.shape_cast %9 : vector<16xf32> to vector<16x1xf32>
    %cst_10 = arith.constant 3.200000e+01 : f32
    %11 = vector.broadcast %cst_10 : f32 to vector<16x1xf32>
    %12 = arith.divf %10, %11 : vector<16x1xf32>
    %13 = vector.broadcast %12 : vector<16x1xf32> to vector<16x32xf32>
    %14 = arith.subf %0, %13 : vector<16x32xf32>
    %15 = arith.mulf %14, %14 : vector<16x32xf32>
    %cst_11 = arith.constant dense<0.000000e+00> : vector<16xf32>
    %16 = vector.multi_reduction <add>, %15, %cst_11 [1] : vector<16x32xf32> to vector<16xf32>
    %17 = vector.shape_cast %16 : vector<16xf32> to vector<16x1xf32>
    %cst_12 = arith.constant 3.200000e+01 : f32
    %18 = vector.broadcast %cst_12 : f32 to vector<16x1xf32>
    %19 = arith.divf %17, %18 : vector<16x1xf32>
    %20 = vector.broadcast %12 : vector<16x1xf32> to vector<16x32xf32>
    %21 = arith.subf %0, %20 : vector<16x32xf32>
    %cst_13 = arith.constant 9.99999974E-6 : f32
    %22 = vector.broadcast %cst_13 : f32 to vector<16x1xf32>
    %23 = arith.addf %19, %22 : vector<16x1xf32>
    %24 = math.rsqrt %23 : vector<16x1xf32>
    %25 = vector.broadcast %24 : vector<16x1xf32> to vector<16x32xf32>
    %26 = arith.mulf %21, %25 : vector<16x32xf32>
    %27 = vector.broadcast %3 : vector<1x32xf32> to vector<16x32xf32>
    %28 = arith.mulf %26, %27 : vector<16x32xf32>
    %29 = vector.broadcast %4 : vector<1x32xf32> to vector<16x32xf32>
    %30 = arith.addf %28, %29 : vector<16x32xf32>
    %c0_14 = arith.constant 0 : index
    %c0_15 = arith.constant 0 : index
    %31 = vector.load %arg2[%c0_14, %c0_15] : memref<32x96xf32, #tpu.memory_space<vmem>>, vector<32x96xf32>
    %cst_16 = arith.constant dense<0.000000e+00> : vector<16x96xf32>
    %32 = tpu.matmul %30, %31, %cst_16 {dimension_numbers = #tpu.dot_dimension_numbers<[1], [0], [0], [1], [0, 0, 1, 1], [], []>} : vector<16x32xf32>, vector<32x96xf32>, vector<16x96xf32> -> vector<16x96xf32>
    %33 = vector.broadcast %1 : vector<1x96xf32> to vector<16x96xf32>
    %34 = arith.addf %32, %33 : vector<16x96xf32>
    %35 = vector.extract_strided_slice %34 {offsets = [0, 0], sizes = [8, 32], strides = [1, 1]} : vector<16x96xf32> to vector<8x32xf32>
    %36 = vector.extract_strided_slice %34 {offsets = [0, 32], sizes = [8, 32], strides = [1, 1]} : vector<16x96xf32> to vector<8x32xf32>
    %37 = vector.extract_strided_slice %34 {offsets = [0, 64], sizes = [8, 32], strides = [1, 1]} : vector<16x96xf32> to vector<8x32xf32>
    %38 = vector.extract_strided_slice %35 {offsets = [0, 0], sizes = [8, 8], strides = [1, 1]} : vector<8x32xf32> to vector<8x8xf32>
    %39 = vector.extract_strided_slice %36 {offsets = [0, 0], sizes = [8, 8], strides = [1, 1]} : vector<8x32xf32> to vector<8x8xf32>
    %40 = vector.extract_strided_slice %37 {offsets = [0, 0], sizes = [8, 8], strides = [1, 1]} : vector<8x32xf32> to vector<8x8xf32>
    %41 = tpu.transpose %39, [1, 0] : vector<8x8xf32> -> vector<8x8xf32>
    %cst_17 = arith.constant dense<0.000000e+00> : vector<8x8xf32>
    %42 = tpu.matmul %38, %41, %cst_17 {dimension_numbers = #tpu.dot_dimension_numbers<[1], [0], [0], [1], [0, 0, 1, 1], [], []>} : vector<8x8xf32>, vector<8x8xf32>, vector<8x8xf32> -> vector<8x8xf32>
    %cst_18 = arith.constant 0.353553385 : f32
    %43 = vector.broadcast %cst_18 : f32 to vector<8x8xf32>
    %44 = arith.mulf %42, %43 : vector<8x8xf32>
    %cst_19 = arith.constant dense<0xFF800000> : vector<8xf32>
    %45 = vector.multi_reduction <maximumf>, %44, %cst_19 [1] : vector<8x8xf32> to vector<8xf32>
    %46 = vector.shape_cast %45 : vector<8xf32> to vector<8x1xf32>
    %47 = vector.broadcast %46 : vector<8x1xf32> to vector<8x8xf32>
    %48 = arith.subf %44, %47 : vector<8x8xf32>
    %49 = math.exp %48 : vector<8x8xf32>
    %cst_20 = arith.constant dense<0.000000e+00> : vector<8xf32>
    %50 = vector.multi_reduction <add>, %49, %cst_20 [1] : vector<8x8xf32> to vector<8xf32>
    %51 = vector.shape_cast %50 : vector<8xf32> to vector<8x1xf32>
    %52 = tpu.reciprocal %51 : vector<8x1xf32> -> vector<8x1xf32>
    %53 = vector.broadcast %52 : vector<8x1xf32> to vector<8x8xf32>
    %54 = arith.mulf %49, %53 : vector<8x8xf32>
    %cst_21 = arith.constant dense<0.000000e+00> : vector<8x8xf32>
    %55 = tpu.matmul %54, %40, %cst_21 {dimension_numbers = #tpu.dot_dimension_numbers<[1], [0], [0], [1], [0, 0, 1, 1], [], []>} : vector<8x8xf32>, vector<8x8xf32>, vector<8x8xf32> -> vector<8x8xf32>
    %c0_22 = arith.constant 0 : index
    %c0_23 = arith.constant 0 : index
    %56 = vector.load %arg8[%c0_22, %c0_23] : memref<16x32xf32, #tpu.memory_space<vmem>>, vector<8x8xf32>
    tpu.vector_store %arg8[%c0_22, %c0_23], %55 {strides = array<i32>} : memref<16x32xf32, #tpu.memory_space<vmem>>, vector<8x8xf32>,
    %57 = vector.extract_strided_slice %35 {offsets = [0, 8], sizes = [8, 8], strides = [1, 1]} : vector<8x32xf32> to vector<8x8xf32>
    %58 = vector.extract_strided_slice %36 {offsets = [0, 8], sizes = [8, 8], strides = [1, 1]} : vector<8x32xf32> to vector<8x8xf32>
    %59 = vector.extract_strided_slice %37 {offsets = [0, 8], sizes = [8, 8], strides = [1, 1]} : vector<8x32xf32> to vector<8x8xf32>
    %60 = tpu.transpose %58, [1, 0] : vector<8x8xf32> -> vector<8x8xf32>
    %cst_24 = arith.constant dense<0.000000e+00> : vector<8x8xf32>
    %61 = tpu.matmul %57, %60, %cst_24 {dimension_numbers = #tpu.dot_dimension_numbers<[1], [0], [0], [1], [0, 0, 1, 1], [], []>} : vector<8x8xf32>, vector<8x8xf32>, vector<8x8xf32> -> vector<8x8xf32>
    %cst_25 = arith.constant 0.353553385 : f32
    %62 = vector.broadcast %cst_25 : f32 to vector<8x8xf32>
    %63 = arith.mulf %61, %62 : vector<8x8xf32>
    %cst_26 = arith.constant dense<0xFF800000> : vector<8xf32>
    %64 = vector.multi_reduction <maximumf>, %63, %cst_26 [1] : vector<8x8xf32> to vector<8xf32>
    %65 = vector.shape_cast %64 : vector<8xf32> to vector<8x1xf32>
    %66 = vector.broadcast %65 : vector<8x1xf32> to vector<8x8xf32>
    %67 = arith.subf %63, %66 : vector<8x8xf32>
    %68 = math.exp %67 : vector<8x8xf32>
    %cst_27 = arith.constant dense<0.000000e+00> : vector<8xf32>
    %69 = vector.multi_reduction <add>, %68, %cst_27 [1] : vector<8x8xf32> to vector<8xf32>
    %70 = vector.shape_cast %69 : vector<8xf32> to vector<8x1xf32>
    %71 = tpu.reciprocal %70 : vector<8x1xf32> -> vector<8x1xf32>
    %72 = vector.broadcast %71 : vector<8x1xf32> to vector<8x8xf32>
    %73 = arith.mulf %68, %72 : vector<8x8xf32>
    %cst_28 = arith.constant dense<0.000000e+00> : vector<8x8xf32>
    %74 = tpu.matmul %73, %59, %cst_28 {dimension_numbers = #tpu.dot_dimension_numbers<[1], [0], [0], [1], [0, 0, 1, 1], [], []>} : vector<8x8xf32>, vector<8x8xf32>, vector<8x8xf32> -> vector<8x8xf32>
    %c0_29 = arith.constant 0 : index
    %c8 = arith.constant 8 : index
    %75 = vector.load %arg8[%c0_29, %c8] : memref<16x32xf32, #tpu.memory_space<vmem>>, vector<8x8xf32>
    tpu.vector_store %arg8[%c0_29, %c8], %74 {strides = array<i32>} : memref<16x32xf32, #tpu.memory_space<vmem>>, vector<8x8xf32>,
    %76 = vector.extract_strided_slice %35 {offsets = [0, 16], sizes = [8, 8], strides = [1, 1]} : vector<8x32xf32> to vector<8x8xf32>
    %77 = vector.extract_strided_slice %36 {offsets = [0, 16], sizes = [8, 8], strides = [1, 1]} : vector<8x32xf32> to vector<8x8xf32>
    %78 = vector.extract_strided_slice %37 {offsets = [0, 16], sizes = [8, 8], strides = [1, 1]} : vector<8x32xf32> to vector<8x8xf32>
    %79 = tpu.transpose %77, [1, 0] : vector<8x8xf32> -> vector<8x8xf32>
    %cst_30 = arith.constant dense<0.000000e+00> : vector<8x8xf32>
    %80 = tpu.matmul %76, %79, %cst_30 {dimension_numbers = #tpu.dot_dimension_numbers<[1], [0], [0], [1], [0, 0, 1, 1], [], []>} : vector<8x8xf32>, vector<8x8xf32>, vector<8x8xf32> -> vector<8x8xf32>
    %cst_31 = arith.constant 0.353553385 : f32
    %81 = vector.broadcast %cst_31 : f32 to vector<8x8xf32>
    %82 = arith.mulf %80, %81 : vector<8x8xf32>
    %cst_32 = arith.constant dense<0xFF800000> : vector<8xf32>
    %83 = vector.multi_reduction <maximumf>, %82, %cst_32 [1] : vector<8x8xf32> to vector<8xf32>
    %84 = vector.shape_cast %83 : vector<8xf32> to vector<8x1xf32>
    %85 = vector.broadcast %84 : vector<8x1xf32> to vector<8x8xf32>
    %86 = arith.subf %82, %85 : vector<8x8xf32>
    %87 = math.exp %86 : vector<8x8xf32>
    %cst_33 = arith.constant dense<0.000000e+00> : vector<8xf32>
    %88 = vector.multi_reduction <add>, %87, %cst_33 [1] : vector<8x8xf32> to vector<8xf32>
    %89 = vector.shape_cast %88 : vector<8xf32> to vector<8x1xf32>
    %90 = tpu.reciprocal %89 : vector<8x1xf32> -> vector<8x1xf32>
    %91 = vector.broadcast %90 : vector<8x1xf32> to vector<8x8xf32>
    %92 = arith.mulf %87, %91 : vector<8x8xf32>
    %cst_34 = arith.constant dense<0.000000e+00> : vector<8x8xf32>
    %93 = tpu.matmul %92, %78, %cst_34 {dimension_numbers = #tpu.dot_dimension_numbers<[1], [0], [0], [1], [0, 0, 1, 1], [], []>} : vector<8x8xf32>, vector<8x8xf32>, vector<8x8xf32> -> vector<8x8xf32>
    %c0_35 = arith.constant 0 : index
    %c16 = arith.constant 16 : index
    %94 = vector.load %arg8[%c0_35, %c16] : memref<16x32xf32, #tpu.memory_space<vmem>>, vector<8x8xf32>
    tpu.vector_store %arg8[%c0_35, %c16], %93 {strides = array<i32>} : memref<16x32xf32, #tpu.memory_space<vmem>>, vector<8x8xf32>,
    %95 = vector.extract_strided_slice %35 {offsets = [0, 24], sizes = [8, 8], strides = [1, 1]} : vector<8x32xf32> to vector<8x8xf32>
    %96 = vector.extract_strided_slice %36 {offsets = [0, 24], sizes = [8, 8], strides = [1, 1]} : vector<8x32xf32> to vector<8x8xf32>
    %97 = vector.extract_strided_slice %37 {offsets = [0, 24], sizes = [8, 8], strides = [1, 1]} : vector<8x32xf32> to vector<8x8xf32>
    %98 = tpu.transpose %96, [1, 0] : vector<8x8xf32> -> vector<8x8xf32>
    %cst_36 = arith.constant dense<0.000000e+00> : vector<8x8xf32>
    %99 = tpu.matmul %95, %98, %cst_36 {dimension_numbers = #tpu.dot_dimension_numbers<[1], [0], [0], [1], [0, 0, 1, 1], [], []>} : vector<8x8xf32>, vector<8x8xf32>, vector<8x8xf32> -> vector<8x8xf32>
    %cst_37 = arith.constant 0.353553385 : f32
    %100 = vector.broadcast %cst_37 : f32 to vector<8x8xf32>
    %101 = arith.mulf %99, %100 : vector<8x8xf32>
    %cst_38 = arith.constant dense<0xFF800000> : vector<8xf32>
    %102 = vector.multi_reduction <maximumf>, %101, %cst_38 [1] : vector<8x8xf32> to vector<8xf32>
    %103 = vector.shape_cast %102 : vector<8xf32> to vector<8x1xf32>
    %104 = vector.broadcast %103 : vector<8x1xf32> to vector<8x8xf32>
    %105 = arith.subf %101, %104 : vector<8x8xf32>
    %106 = math.exp %105 : vector<8x8xf32>
    %cst_39 = arith.constant dense<0.000000e+00> : vector<8xf32>
    %107 = vector.multi_reduction <add>, %106, %cst_39 [1] : vector<8x8xf32> to vector<8xf32>
    %108 = vector.shape_cast %107 : vector<8xf32> to vector<8x1xf32>
    %109 = tpu.reciprocal %108 : vector<8x1xf32> -> vector<8x1xf32>
    %110 = vector.broadcast %109 : vector<8x1xf32> to vector<8x8xf32>
    %111 = arith.mulf %106, %110 : vector<8x8xf32>
    %cst_40 = arith.constant dense<0.000000e+00> : vector<8x8xf32>
    %112 = tpu.matmul %111, %97, %cst_40 {dimension_numbers = #tpu.dot_dimension_numbers<[1], [0], [0], [1], [0, 0, 1, 1], [], []>} : vector<8x8xf32>, vector<8x8xf32>, vector<8x8xf32> -> vector<8x8xf32>
    %c0_41 = arith.constant 0 : index
    %c24 = arith.constant 24 : index
    %113 = vector.load %arg8[%c0_41, %c24] : memref<16x32xf32, #tpu.memory_space<vmem>>, vector<8x8xf32>
    tpu.vector_store %arg8[%c0_41, %c24], %112 {strides = array<i32>} : memref<16x32xf32, #tpu.memory_space<vmem>>, vector<8x8xf32>,
    %114 = vector.extract_strided_slice %34 {offsets = [8, 0], sizes = [8, 32], strides = [1, 1]} : vector<16x96xf32> to vector<8x32xf32>
    %115 = vector.extract_strided_slice %34 {offsets = [8, 32], sizes = [8, 32], strides = [1, 1]} : vector<16x96xf32> to vector<8x32xf32>
    %116 = vector.extract_strided_slice %34 {offsets = [8, 64], sizes = [8, 32], strides = [1, 1]} : vector<16x96xf32> to vector<8x32xf32>
    %117 = vector.extract_strided_slice %114 {offsets = [0, 0], sizes = [8, 8], strides = [1, 1]} : vector<8x32xf32> to vector<8x8xf32>
    %118 = vector.extract_strided_slice %115 {offsets = [0, 0], sizes = [8, 8], strides = [1, 1]} : vector<8x32xf32> to vector<8x8xf32>
    %119 = vector.extract_strided_slice %116 {offsets = [0, 0], sizes = [8, 8], strides = [1, 1]} : vector<8x32xf32> to vector<8x8xf32>
    %120 = tpu.transpose %118, [1, 0] : vector<8x8xf32> -> vector<8x8xf32>
    %cst_42 = arith.constant dense<0.000000e+00> : vector<8x8xf32>
    %121 = tpu.matmul %117, %120, %cst_42 {dimension_numbers = #tpu.dot_dimension_numbers<[1], [0], [0], [1], [0, 0, 1, 1], [], []>} : vector<8x8xf32>, vector<8x8xf32>, vector<8x8xf32> -> vector<8x8xf32>
    %cst_43 = arith.constant 0.353553385 : f32
    %122 = vector.broadcast %cst_43 : f32 to vector<8x8xf32>
    %123 = arith.mulf %121, %122 : vector<8x8xf32>
    %cst_44 = arith.constant dense<0xFF800000> : vector<8xf32>
    %124 = vector.multi_reduction <maximumf>, %123, %cst_44 [1] : vector<8x8xf32> to vector<8xf32>
    %125 = vector.shape_cast %124 : vector<8xf32> to vector<8x1xf32>
    %126 = vector.broadcast %125 : vector<8x1xf32> to vector<8x8xf32>
    %127 = arith.subf %123, %126 : vector<8x8xf32>
    %128 = math.exp %127 : vector<8x8xf32>
    %cst_45 = arith.constant dense<0.000000e+00> : vector<8xf32>
    %129 = vector.multi_reduction <add>, %128, %cst_45 [1] : vector<8x8xf32> to vector<8xf32>
    %130 = vector.shape_cast %129 : vector<8xf32> to vector<8x1xf32>
    %131 = tpu.reciprocal %130 : vector<8x1xf32> -> vector<8x1xf32>
    %132 = vector.broadcast %131 : vector<8x1xf32> to vector<8x8xf32>
    %133 = arith.mulf %128, %132 : vector<8x8xf32>
    %cst_46 = arith.constant dense<0.000000e+00> : vector<8x8xf32>
    %134 = tpu.matmul %133, %119, %cst_46 {dimension_numbers = #tpu.dot_dimension_numbers<[1], [0], [0], [1], [0, 0, 1, 1], [], []>} : vector<8x8xf32>, vector<8x8xf32>, vector<8x8xf32> -> vector<8x8xf32>
    %c8_47 = arith.constant 8 : index
    %c0_48 = arith.constant 0 : index
    %135 = vector.load %arg8[%c8_47, %c0_48] : memref<16x32xf32, #tpu.memory_space<vmem>>, vector<8x8xf32>
    tpu.vector_store %arg8[%c8_47, %c0_48], %134 {strides = array<i32>} : memref<16x32xf32, #tpu.memory_space<vmem>>, vector<8x8xf32>,
    %136 = vector.extract_strided_slice %114 {offsets = [0, 8], sizes = [8, 8], strides = [1, 1]} : vector<8x32xf32> to vector<8x8xf32>
    %137 = vector.extract_strided_slice %115 {offsets = [0, 8], sizes = [8, 8], strides = [1, 1]} : vector<8x32xf32> to vector<8x8xf32>
    %138 = vector.extract_strided_slice %116 {offsets = [0, 8], sizes = [8, 8], strides = [1, 1]} : vector<8x32xf32> to vector<8x8xf32>
    %139 = tpu.transpose %137, [1, 0] : vector<8x8xf32> -> vector<8x8xf32>
    %cst_49 = arith.constant dense<0.000000e+00> : vector<8x8xf32>
    %140 = tpu.matmul %136, %139, %cst_49 {dimension_numbers = #tpu.dot_dimension_numbers<[1], [0], [0], [1], [0, 0, 1, 1], [], []>} : vector<8x8xf32>, vector<8x8xf32>, vector<8x8xf32> -> vector<8x8xf32>
    %cst_50 = arith.constant 0.353553385 : f32
    %141 = vector.broadcast %cst_50 : f32 to vector<8x8xf32>
    %142 = arith.mulf %140, %141 : vector<8x8xf32>
    %cst_51 = arith.constant dense<0xFF800000> : vector<8xf32>
    %143 = vector.multi_reduction <maximumf>, %142, %cst_51 [1] : vector<8x8xf32> to vector<8xf32>
    %144 = vector.shape_cast %143 : vector<8xf32> to vector<8x1xf32>
    %145 = vector.broadcast %144 : vector<8x1xf32> to vector<8x8xf32>
    %146 = arith.subf %142, %145 : vector<8x8xf32>
    %147 = math.exp %146 : vector<8x8xf32>
    %cst_52 = arith.constant dense<0.000000e+00> : vector<8xf32>
    %148 = vector.multi_reduction <add>, %147, %cst_52 [1] : vector<8x8xf32> to vector<8xf32>
    %149 = vector.shape_cast %148 : vector<8xf32> to vector<8x1xf32>
    %150 = tpu.reciprocal %149 : vector<8x1xf32> -> vector<8x1xf32>
    %151 = vector.broadcast %150 : vector<8x1xf32> to vector<8x8xf32>
    %152 = arith.mulf %147, %151 : vector<8x8xf32>
    %cst_53 = arith.constant dense<0.000000e+00> : vector<8x8xf32>
    %153 = tpu.matmul %152, %138, %cst_53 {dimension_numbers = #tpu.dot_dimension_numbers<[1], [0], [0], [1], [0, 0, 1, 1], [], []>} : vector<8x8xf32>, vector<8x8xf32>, vector<8x8xf32> -> vector<8x8xf32>
    %c8_54 = arith.constant 8 : index
    %c8_55 = arith.constant 8 : index
    %154 = vector.load %arg8[%c8_54, %c8_55] : memref<16x32xf32, #tpu.memory_space<vmem>>, vector<8x8xf32>
    tpu.vector_store %arg8[%c8_54, %c8_55], %153 {strides = array<i32>} : memref<16x32xf32, #tpu.memory_space<vmem>>, vector<8x8xf32>,
    %155 = vector.extract_strided_slice %114 {offsets = [0, 16], sizes = [8, 8], strides = [1, 1]} : vector<8x32xf32> to vector<8x8xf32>
    %156 = vector.extract_strided_slice %115 {offsets = [0, 16], sizes = [8, 8], strides = [1, 1]} : vector<8x32xf32> to vector<8x8xf32>
    %157 = vector.extract_strided_slice %116 {offsets = [0, 16], sizes = [8, 8], strides = [1, 1]} : vector<8x32xf32> to vector<8x8xf32>
    %158 = tpu.transpose %156, [1, 0] : vector<8x8xf32> -> vector<8x8xf32>
    %cst_56 = arith.constant dense<0.000000e+00> : vector<8x8xf32>
    %159 = tpu.matmul %155, %158, %cst_56 {dimension_numbers = #tpu.dot_dimension_numbers<[1], [0], [0], [1], [0, 0, 1, 1], [], []>} : vector<8x8xf32>, vector<8x8xf32>, vector<8x8xf32> -> vector<8x8xf32>
    %cst_57 = arith.constant 0.353553385 : f32
    %160 = vector.broadcast %cst_57 : f32 to vector<8x8xf32>
    %161 = arith.mulf %159, %160 : vector<8x8xf32>
    %cst_58 = arith.constant dense<0xFF800000> : vector<8xf32>
    %162 = vector.multi_reduction <maximumf>, %161, %cst_58 [1] : vector<8x8xf32> to vector<8xf32>
    %163 = vector.shape_cast %162 : vector<8xf32> to vector<8x1xf32>
    %164 = vector.broadcast %163 : vector<8x1xf32> to vector<8x8xf32>
    %165 = arith.subf %161, %164 : vector<8x8xf32>
    %166 = math.exp %165 : vector<8x8xf32>
    %cst_59 = arith.constant dense<0.000000e+00> : vector<8xf32>
    %167 = vector.multi_reduction <add>, %166, %cst_59 [1] : vector<8x8xf32> to vector<8xf32>
    %168 = vector.shape_cast %167 : vector<8xf32> to vector<8x1xf32>
    %169 = tpu.reciprocal %168 : vector<8x1xf32> -> vector<8x1xf32>
    %170 = vector.broadcast %169 : vector<8x1xf32> to vector<8x8xf32>
    %171 = arith.mulf %166, %170 : vector<8x8xf32>
    %cst_60 = arith.constant dense<0.000000e+00> : vector<8x8xf32>
    %172 = tpu.matmul %171, %157, %cst_60 {dimension_numbers = #tpu.dot_dimension_numbers<[1], [0], [0], [1], [0, 0, 1, 1], [], []>} : vector<8x8xf32>, vector<8x8xf32>, vector<8x8xf32> -> vector<8x8xf32>
    %c8_61 = arith.constant 8 : index
    %c16_62 = arith.constant 16 : index
    %173 = vector.load %arg8[%c8_61, %c16_62] : memref<16x32xf32, #tpu.memory_space<vmem>>, vector<8x8xf32>
    tpu.vector_store %arg8[%c8_61, %c16_62], %172 {strides = array<i32>} : memref<16x32xf32, #tpu.memory_space<vmem>>, vector<8x8xf32>,
    %174 = vector.extract_strided_slice %114 {offsets = [0, 24], sizes = [8, 8], strides = [1, 1]} : vector<8x32xf32> to vector<8x8xf32>
    %175 = vector.extract_strided_slice %115 {offsets = [0, 24], sizes = [8, 8], strides = [1, 1]} : vector<8x32xf32> to vector<8x8xf32>
    %176 = vector.extract_strided_slice %116 {offsets = [0, 24], sizes = [8, 8], strides = [1, 1]} : vector<8x32xf32> to vector<8x8xf32>
    %177 = tpu.transpose %175, [1, 0] : vector<8x8xf32> -> vector<8x8xf32>
    %cst_63 = arith.constant dense<0.000000e+00> : vector<8x8xf32>
    %178 = tpu.matmul %174, %177, %cst_63 {dimension_numbers = #tpu.dot_dimension_numbers<[1], [0], [0], [1], [0, 0, 1, 1], [], []>} : vector<8x8xf32>, vector<8x8xf32>, vector<8x8xf32> -> vector<8x8xf32>
    %cst_64 = arith.constant 0.353553385 : f32
    %179 = vector.broadcast %cst_64 : f32 to vector<8x8xf32>
    %180 = arith.mulf %178, %179 : vector<8x8xf32>
    %cst_65 = arith.constant dense<0xFF800000> : vector<8xf32>
    %181 = vector.multi_reduction <maximumf>, %180, %cst_65 [1] : vector<8x8xf32> to vector<8xf32>
    %182 = vector.shape_cast %181 : vector<8xf32> to vector<8x1xf32>
    %183 = vector.broadcast %182 : vector<8x1xf32> to vector<8x8xf32>
    %184 = arith.subf %180, %183 : vector<8x8xf32>
    %185 = math.exp %184 : vector<8x8xf32>
    %cst_66 = arith.constant dense<0.000000e+00> : vector<8xf32>
    %186 = vector.multi_reduction <add>, %185, %cst_66 [1] : vector<8x8xf32> to vector<8xf32>
    %187 = vector.shape_cast %186 : vector<8xf32> to vector<8x1xf32>
    %188 = tpu.reciprocal %187 : vector<8x1xf32> -> vector<8x1xf32>
    %189 = vector.broadcast %188 : vector<8x1xf32> to vector<8x8xf32>
    %190 = arith.mulf %185, %189 : vector<8x8xf32>
    %cst_67 = arith.constant dense<0.000000e+00> : vector<8x8xf32>
    %191 = tpu.matmul %190, %176, %cst_67 {dimension_numbers = #tpu.dot_dimension_numbers<[1], [0], [0], [1], [0, 0, 1, 1], [], []>} : vector<8x8xf32>, vector<8x8xf32>, vector<8x8xf32> -> vector<8x8xf32>
    %c8_68 = arith.constant 8 : index
    %c24_69 = arith.constant 24 : index
    %192 = vector.load %arg8[%c8_68, %c24_69] : memref<16x32xf32, #tpu.memory_space<vmem>>, vector<8x8xf32>
    tpu.vector_store %arg8[%c8_68, %c24_69], %191 {strides = array<i32>} : memref<16x32xf32, #tpu.memory_space<vmem>>, vector<8x8xf32>,
    %c0_70 = arith.constant 0 : index
    %c0_71 = arith.constant 0 : index
    %193 = vector.load %arg8[%c0_70, %c0_71] : memref<16x32xf32, #tpu.memory_space<vmem>>, vector<16x32xf32>
    %c0_72 = arith.constant 0 : index
    %c0_73 = arith.constant 0 : index
    %194 = vector.load %arg3[%c0_72, %c0_73] : memref<32x32xf32, #tpu.memory_space<vmem>>, vector<32x32xf32>
    %cst_74 = arith.constant dense<0.000000e+00> : vector<16x32xf32>
    %195 = tpu.matmul %193, %194, %cst_74 {dimension_numbers = #tpu.dot_dimension_numbers<[1], [0], [0], [1], [0, 0, 1, 1], [], []>} : vector<16x32xf32>, vector<32x32xf32>, vector<16x32xf32> -> vector<16x32xf32>
    %196 = vector.broadcast %7 : vector<1x32xf32> to vector<16x32xf32>
    %197 = arith.addf %195, %196 : vector<16x32xf32>
    %198 = arith.addf %0, %197 : vector<16x32xf32>
    %cst_75 = arith.constant dense<0.000000e+00> : vector<16xf32>
    %199 = vector.multi_reduction <add>, %198, %cst_75 [1] : vector<16x32xf32> to vector<16xf32>
    %200 = vector.shape_cast %199 : vector<16xf32> to vector<16x1xf32>
    %cst_76 = arith.constant 3.200000e+01 : f32
    %201 = vector.broadcast %cst_76 : f32 to vector<16x1xf32>
    %202 = arith.divf %200, %201 : vector<16x1xf32>
    %203 = vector.broadcast %202 : vector<16x1xf32> to vector<16x32xf32>
    %204 = arith.subf %198, %203 : vector<16x32xf32>
    %205 = arith.mulf %204, %204 : vector<16x32xf32>
    %cst_77 = arith.constant dense<0.000000e+00> : vector<16xf32>
    %206 = vector.multi_reduction <add>, %205, %cst_77 [1] : vector<16x32xf32> to vector<16xf32>
    %207 = vector.shape_cast %206 : vector<16xf32> to vector<16x1xf32>
    %cst_78 = arith.constant 3.200000e+01 : f32
    %208 = vector.broadcast %cst_78 : f32 to vector<16x1xf32>
    %209 = arith.divf %207, %208 : vector<16x1xf32>
    %210 = vector.broadcast %202 : vector<16x1xf32> to vector<16x32xf32>
    %211 = arith.subf %198, %210 : vector<16x32xf32>
    %cst_79 = arith.constant 9.99999974E-6 : f32
    %212 = vector.broadcast %cst_79 : f32 to vector<16x1xf32>
    %213 = arith.addf %209, %212 : vector<16x1xf32>
    %214 = math.rsqrt %213 : vector<16x1xf32>
    %215 = vector.broadcast %214 : vector<16x1xf32> to vector<16x32xf32>
    %216 = arith.mulf %211, %215 : vector<16x32xf32>
    %217 = vector.broadcast %5 : vector<1x32xf32> to vector<16x32xf32>
    %218 = arith.mulf %216, %217 : vector<16x32xf32>
    %219 = vector.broadcast %6 : vector<1x32xf32> to vector<16x32xf32>
    %220 = arith.addf %218, %219 : vector<16x32xf32>
    %c0_80 = arith.constant 0 : index
    %c0_81 = arith.constant 0 : index
    %221 = vector.load %arg4[%c0_80, %c0_81] : memref<32x64xf32, #tpu.memory_space<vmem>>, vector<32x64xf32>
    %cst_82 = arith.constant dense<0.000000e+00> : vector<16x64xf32>
    %222 = tpu.matmul %220, %221, %cst_82 {dimension_numbers = #tpu.dot_dimension_numbers<[1], [0], [0], [1], [0, 0, 1, 1], [], []>} : vector<16x32xf32>, vector<32x64xf32>, vector<16x64xf32> -> vector<16x64xf32>
    %223 = vector.broadcast %2 : vector<1x64xf32> to vector<16x64xf32>
    %224 = arith.addf %222, %223 : vector<16x64xf32>
    %225 = arith.mulf %224, %224 : vector<16x64xf32>
    %226 = arith.mulf %224, %225 : vector<16x64xf32>
    %cst_83 = arith.constant 4.471500e-02 : f32
    %227 = vector.broadcast %cst_83 : f32 to vector<16x64xf32>
    %228 = arith.mulf %227, %226 : vector<16x64xf32>
    %229 = arith.addf %224, %228 : vector<16x64xf32>
    %cst_84 = arith.constant 0.797884583 : f32
    %230 = vector.broadcast %cst_84 : f32 to vector<16x64xf32>
    %231 = arith.mulf %230, %229 : vector<16x64xf32>
    %232 = math.tanh %231 : vector<16x64xf32>
    %cst_85 = arith.constant 1.000000e+00 : f32
    %233 = vector.broadcast %cst_85 : f32 to vector<16x64xf32>
    %234 = arith.addf %233, %232 : vector<16x64xf32>
    %cst_86 = arith.constant 5.000000e-01 : f32
    %235 = vector.broadcast %cst_86 : f32 to vector<16x64xf32>
    %236 = arith.mulf %235, %234 : vector<16x64xf32>
    %237 = arith.mulf %224, %236 : vector<16x64xf32>
    %c0_87 = arith.constant 0 : index
    %c0_88 = arith.constant 0 : index
    %238 = vector.load %arg5[%c0_87, %c0_88] : memref<64x32xf32, #tpu.memory_space<vmem>>, vector<64x32xf32>
    %cst_89 = arith.constant dense<0.000000e+00> : vector<16x32xf32>
    %239 = tpu.matmul %237, %238, %cst_89 {dimension_numbers = #tpu.dot_dimension_numbers<[1], [0], [0], [1], [0, 0, 1, 1], [], []>} : vector<16x64xf32>, vector<64x32xf32>, vector<16x32xf32> -> vector<16x32xf32>
    %240 = vector.broadcast %8 : vector<1x32xf32> to vector<16x32xf32>
    %241 = arith.addf %239, %240 : vector<16x32xf32>
    %242 = arith.addf %198, %241 : vector<16x32xf32>
    %c0_90 = arith.constant 0 : index
    %c0_91 = arith.constant 0 : index
    %243 = vector.load %arg7[%c0_90, %c0_91] : memref<16x32xf32, #tpu.memory_space<vmem>>, vector<16x32xf32>
    tpu.vector_store %arg7[%c0_90, %c0_91], %242 {strides = array<i32>} : memref<16x32xf32, #tpu.memory_space<vmem>>, vector<16x32xf32>,
    return
  }
  func.func @transform_0(%arg0: i32) -> (i32, i32) {
    %c0_i32 = arith.constant 0 : i32
    %c0_i32_0 = arith.constant 0 : i32
    %c0_i32_1 = arith.constant 0 : i32
    return %c0_i32, %c0_i32_0 : i32, i32
  }
  func.func @transform_1(%arg0: i32) -> (i32, i32) {
    %c0_i32 = arith.constant 0 : i32
    %c0_i32_0 = arith.constant 0 : i32
    %c0_i32_1 = arith.constant 0 : i32
    return %c0_i32, %c0_i32_0 : i32, i32
  }
  func.func @transform_2(%arg0: i32) -> (i32, i32) {
    %c0_i32 = arith.constant 0 : i32
    %c0_i32_0 = arith.constant 0 : i32
    %c0_i32_1 = arith.constant 0 : i32
    return %c0_i32, %c0_i32_0 : i32, i32
  }
  func.func @transform_3(%arg0: i32) -> (i32, i32) {
    %c0_i32 = arith.constant 0 : i32
    %c0_i32_0 = arith.constant 0 : i32
    %c0_i32_1 = arith.constant 0 : i32
    return %c0_i32, %c0_i32_0 : i32, i32
  }
  func.func @transform_4(%arg0: i32) -> (i32, i32) {
    %c0_i32 = arith.constant 0 : i32
    %c0_i32_0 = arith.constant 0 : i32
    %c0_i32_1 = arith.constant 0 : i32
    return %c0_i32, %c0_i32_0 : i32, i32
  }
  func.func @transform_5(%arg0: i32) -> (i32, i32) {
    %c0_i32 = arith.constant 0 : i32
    %c0_i32_0 = arith.constant 0 : i32
    %c0_i32_1 = arith.constant 0 : i32
    return %c0_i32, %c0_i32_0 : i32, i32
  }
  func.func @transform_6(%arg0: i32) -> (i32, i32) {
    %c0_i32 = arith.constant 0 : i32
    %c0_i32_0 = arith.constant 0 : i32
    %c0_i32_1 = arith.constant 0 : i32
    return %c0_i32, %c0_i32_0 : i32, i32
  }
}

</mosaic_0001>

<bundles_post_ra>
// kernel: tpu_custom_call.1
= control target key start
LH: loop header
LB: loop body
LE: loop exit
PB: predicated region body
PF: predicated region fallthrough
CT: control target
= control target key end

     0   :  { %11 = vsyncpa [#allocation4], 0  ;;  %s2623_s0 = inlined_call_operand.hbm [shape: f32[16,32], index: 0, kind: input, shape index: {}]   ;;  %s2624_s1 = inlined_call_operand.vmem [shape: f32[32,96], index: 1, kind: input, shape index: {}]   ;;  %s2625_s2 = inlined_call_operand.vmem [shape: f32[32,32], index: 2, kind: input, shape index: {}]   ;;  %s2626_s3 = inlined_call_operand.vmem [shape: f32[32,64], index: 3, kind: input, shape index: {}]   ;;  %s2627_s4 = inlined_call_operand.vmem [shape: f32[64,32], index: 4, kind: input, shape index: {}]   ;;  %s2628_s5 = inlined_call_operand.vmem [shape: f32[8,96], index: 5, kind: input, shape index: {}]   ;;  %s2629_s6 = inlined_call_operand.hbm [shape: f32[16,32], index: 6, kind: output, shape index: {}]  }
   0x1   :  { %12 = vsyncpa [#allocation5], 0  ;;  %s2275_s21 = smov [#allocation3]   ;;  %s2227_s25 = scalar_lea.hbm %s2623_s0, 256 }
   0x2   :  { %s18_s22 = sshll.u32 %s2275_s21, 4  ;;  %p2228_p0 = scmp.ne.s32.totalorder %s2623_s0, %s2227_s25  ;;  %s19_s22 = int_to_ptr.vmem [resolvable:$true] %s18_s22 }
   0x3   :  { %p2231_p1 = scmp.lt.u32.totalorder %s2227_s25, %s2623_s0 }
   0x5   :  { %p2233_p2 = pnand %p2231_p1, %p2228_p0 }
   0x7   :  { %2236 = shalt.err (!%p2233_p2)
}
   0x8   :  { %s2237_s30 = scalar_lea.vmem %s19_s22, 256  ;;  %p2242_p4 = scmp.lt.s32.totalorder %s19_s22, %s19_s22 }
   0x9   :  { %p2238_p3 = scmp.ne.s32.totalorder %s19_s22, %s2237_s30  ;;  %p2243_p5 = scmp.lt.s32.totalorder %s2237_s30, %s2237_s30 }
   0xb   :  { %p2244_p6 = por %p2243_p5, %p2242_p4 }
   0xd   :  { %p2245_p7 = pnand %p2244_p6, %p2238_p3 }
   0xf   :  { %2248 = shalt.err (!%p2245_p7)
}
  0x10   :  { %s2276_s7 = smov 128   ;;  %s2277_s8 = smov 8  }
  0x11   :  { %24 = dma.hbm_to_vmem [thread:$0]  %s2623_s0, 256, %s19_s22, [#allocation4], %s2276_s7, %s2276_s7, %s2277_s8  }
  0x12   :  { %2271 = dma.done.wait [#allocation4], 256  }
  0x13   :  { %2272 = vsyncadd [#allocation4], 4294967040  ;;  %vm48_vm0 = vcmask 261120   ;;  %v2344_v0 = vld [vmem:[#allocation3] sm:$0xff]  ;;  %v2346_v1 = vld [vmem:[#allocation3 + $0x8] sm:$0xff]  ;;  %v2278_v36 = vmov 0.0  }
  0x14   :  { %v49_v2 = vsel %vm48_vm0, %v2344_v0, 0.0  ;;  %v52_v3 = vsel %vm48_vm0, %v2346_v1, 0.0  ;;  %v88_v14 = vld [vmem:[%s2624_s1] sm:$0xff]  ;;  %v89_v15 = vld [vmem:[%s2624_s1 + $0x8] sm:$0xff]  ;;  %v90_v16 = vld [vmem:[%s2624_s1 + $0x10] sm:$0xff]  ;;  %2013 = vmatprep.subr.mxu0 %v2278_v36  ;;  %vm2279_vm1 = vmmov 0  }
  0x15   :  { %50 = vadd.xlane.f32.xlu0 %v49_v2  ;;  %v2124_v17 = vpack.c.bf16 %v89_v15, %v88_v14  ;;  %v91_v18 = vld [vmem:[%s2624_s1 + $0x18] sm:$0xff]  ;;  %v1892_v27 = vld [vmem:[%s2628_s5 + $0x2] ss:$0 sm:$0xff]  ;;  %v1893_v29 = vld [vmem:[%s2628_s5 + $0x3] ss:$0 sm:$0xff]  ;;  %2015 = vmatprep.mubr.msk.f32.mxu0 %vm2279_vm1, %v2278_v36  ;;  %s2280_s23 = smov 88  }
  0x16   :  { %v2128_v19 = vpack.c.bf16 %v91_v18, %v90_v16  ;;  %v1894_v37 = vld [vmem:[%s2628_s5] ss:$0 sm:$0xff]  ;;  %s2281_s24 = smov 96   ;;  %s2282_s25 = smov 120   ;;  %vm180_vm2 = vcmask 64512   ;;  %vm514_vm3 = vcmask 130112  }
  0x17   :  { %2125 = vmatprep.subr.bf16.mxu1 %v2124_v17  ;;  %s2283_s26 = smov 112   ;;  %s2284_s27 = smov 80   ;;  %vm686_vm4 = vcmask 195712   ;;  %vm858_vm5 = vcmask 261312   ;;  %vm1789_vm6 = vcmask 523264  }
  0x18   :  { %2127 = vmatpush3.bf16.msra.mxu1 %v2124_v17  ;;  %s2285_s28 = smov 104   ;;  %s2286_s29 = smov 72  }
  0x19   :  { %53 = vadd.xlane.f32.xlu0 %v52_v3  ;;  %2129 = vmatprep.subr.bf16.mxu1 %v2128_v19  ;;  %s2287_s30 = smov 64   ;;  %s2288_s9 = smov 48  }
  0x1a   :  { %s2289_s10 = smov 40   ;;  %s2290_s0 = smov 56  }
  0x1b   :  { %s2291_s11 = smov 16   ;;  %s2292_s12 = smov 24  }
  0x1c   :  { %2131 = vmatpush3.bf16.msra.mxu1 %v2128_v19 }
  0x1d   :  { %2003 = vmatprep.subr.mxu1 %v2278_v36 }
  0xa2   :  { %v51_v4 = vpop.xlane.xlu0 %50 }
  0xa3   :  { %v56_v5 = vmul.f32 0.03125, %v51_v4 }
  0xa5   :  { %v58_v6 = vsub.f32 %v2344_v0, %v56_v5 }
  0xa6   :  { %v54_v7 = vpop.xlane.xlu0 %53 }
  0xa7   :  { %v57_v8 = vmul.f32 0.03125, %v54_v7  ;;  %v60_v9 = vmul.f32 %v58_v6, %v58_v6 }
  0xa9   :  { %v59_v10 = vsub.f32 %v2346_v1, %v57_v8  ;;  %v62_v11 = vsel %vm48_vm0, %v60_v9, 0.0 }
  0xaa   :  { %63 = vadd.xlane.f32.xlu1 %v62_v11 }
  0xab   :  { %v61_v12 = vmul.f32 %v59_v10, %v59_v10 }
  0xad   :  { %v65_v13 = vsel %vm48_vm0, %v61_v12, 0.0 }
  0xae   :  { %66 = vadd.xlane.f32.xlu1 %v65_v13 }
 0x137   :  { %v64_v20 = vpop.xlane.xlu1 %63 }
 0x138   :  { %v68_v21 = vmul.f32 0.03125, %v64_v20 }
 0x13a   :  { %v70_v22 = vadd.f32 1e-05, %v68_v21 }
 0x13b   :  { %v67_v23 = vpop.xlane.xlu1 %66 }
 0x13c   :  { %2183 = vrsqrt.f32 %v70_v22  ;;  %v69_v24 = vmul.f32 0.03125, %v67_v23 }
 0x13e   :  { %v71_v25 = vadd.f32 1e-05, %v69_v24 }
 0x140   :  { %2185 = vrsqrt.f32 %v71_v25 }
 0x146   :  { %v2184_v26 = vpop.eup %2183 }
 0x147   :  { %v74_v28 = vmul.f32 %v2184_v26, %v58_v6 }
 0x149   :  { %v80_v30 = vmul.f32 %v1892_v27, %v74_v28 }
 0x14a   :  { %v2186_v31 = vpop.eup %2185 }
 0x14b   :  { %v75_v32 = vmul.f32 %v2186_v31, %v59_v10  ;;  %v86_v33 = vadd.f32 %v1893_v29, %v80_v30 }
 0x14d   :  { %v81_v34 = vmul.f32 %v1892_v27, %v75_v32  ;;  %2000 = vmatprep.mubr.msk.f32.mxu1 %vm48_vm0, %v86_v33 }
 0x14f   :  { %v87_v35 = vadd.f32 %v1893_v29, %v81_v34 }
 0x151   :  { %2001 = vmatmul.mubr.msk.f32.vlgmr.msra.gmra.mrb[0].mxu1 %vm48_vm0, %v87_v35 }
 0x152   :  { %2005 = vmatprep.mubr.msk.f32.mxu1 %vm2279_vm1, %v2278_v36 }
 0x224   :  { %v2002_v38 = vpop.f32.mrb[0].mxu1 }
 0x225   :  { %v168_v39 = vpop.f32.mrb[1].mxu1  ;;  %v2393_v41 = vadd.f32 %v2002_v38, %v1894_v37 }
 0x226   :  { %v2385_v40 = vadd.f32 %v1894_v37, %v168_v39 }
 0x228   :  { %346 = vrot.lane.b32.xlu1 %v2385_v40, %s2280_s23  ;;  %178 = vrot.lane.b32.xlu0 %v2385_v40, %s2281_s24 }
 0x22c   :  { %344 = vrot.lane.b32.xlu1 %v2385_v40, %s2282_s25  ;;  %516 = vrot.lane.b32.xlu0 %v2385_v40, %s2283_s26 }
 0x230   :  { %518 = vrot.lane.b32.xlu1 %v2385_v40, %s2284_s27  ;;  %688 = vrot.lane.b32.xlu0 %v2385_v40, %s2285_s28 }
 0x234   :  { %690 = vrot.lane.b32.xlu1 %v2385_v40, %s2286_s29  ;;  %1028 = vrot.lane.b32.xlu0 %v2393_v41, %s2280_s23 }
 0x238   :  { %861 = vrot.lane.b32.xlu1 %v2393_v41, %s2281_s24  ;;  %1199 = vrot.lane.b32.xlu0 %v2393_v41, %s2284_s27 }
 0x23c   :  { %1026 = vrot.lane.b32.xlu1 %v2393_v41, %s2282_s25  ;;  %1370 = vrot.lane.b32.xlu0 %v2393_v41, %s2286_s29 }
 0x240   :  { %1197 = vrot.lane.b32.xlu1 %v2393_v41, %s2283_s26  ;;  %s2293_s26 = smov [#allocation6]  }
 0x241   :  { %s1880_s27 = sshll.u32 %s2293_s26, 4  ;;  %s1881_s27 = int_to_ptr.vmem [resolvable:$true] %s1880_s27 }
 0x242   :  { %p2254_p9 = scmp.lt.s32.totalorder %s1881_s27, %s1881_s27 }
 0x244   :  { %1368 = vrot.lane.b32.xlu1 %v2393_v41, %s2285_s28  ;;  %s2249_s28 = scalar_lea.vmem %s1881_s27, 256 }
 0x245   :  { %p2250_p8 = scmp.ne.s32.totalorder %s1881_s27, %s2249_s28  ;;  %p2255_p10 = scmp.lt.s32.totalorder %s2249_s28, %s2249_s28 }
 0x247   :  { %p2256_p11 = por %p2255_p10, %p2254_p9 }
 0x249   :  { %p2257_p12 = pnand %p2256_p11, %p2250_p8 }
 0x29a   :  { %v347_v42 = vpop.permute.xlu1 %346  ;;  %v179_v43 = vpop.permute.xlu0 %178 }
 0x29b   :  { %2004 = vmatpush3.xpose.msk.msra.mxu1 %vm180_vm2, %v179_v43  ;;  %2014 = vmatpush3.xpose.msk.msra.mxu0 %vm180_vm2, %v347_v42 }
 0x29c   :  { %2023 = vmatprep.subr.mxu0 %v2278_v36  ;;  %2008 = vmatprep.subr.mxu1 %v2278_v36 }
 0x29e   :  { %v345_v44 = vpop.permute.xlu1 %344  ;;  %2006 = vmatmul.mubr.msk.f32.vlgmr.msra.gmra.mrb[2].mxu1 %vm180_vm2, %v2385_v40  ;;  %v517_v45 = vpop.permute.xlu0 %516 }
 0x29f   :  { %2016 = vmatmul.mubr.msk.f32.vlgmr.msra.gmra.mrb[0].mxu0 %vm180_vm2, %v345_v44  ;;  %2010 = vmatprep.mubr.msk.f32.mxu1 %vm2279_vm1, %v2278_v36 }
 0x2a0   :  { %2025 = vmatprep.mubr.msk.f32.mxu0 %vm2279_vm1, %v2278_v36 }
 0x2a2   :  { %v519_v46 = vpop.permute.xlu1 %518  ;;  %v689_v47 = vpop.permute.xlu0 %688 }
 0x2a3   :  { %2024 = vmatpush3.xpose.msk.msra.mxu0 %vm180_vm2, %v519_v46 }
 0x2a4   :  { %2033 = vmatprep.subr.mxu0 %v2278_v36 }
 0x2a6   :  { %v691_v48 = vpop.permute.xlu1 %690  ;;  %2026 = vmatmul.mubr.msk.f32.vlgmr.msra.gmra.mrb[2].mxu0 %vm180_vm2, %v517_v45  ;;  %v1029_v49 = vpop.permute.xlu0 %1028 }
 0x2a7   :  { %2034 = vmatpush3.xpose.msk.msra.mxu0 %vm180_vm2, %v691_v48  ;;  %2035 = vmatprep.mubr.msk.f32.mxu0 %vm2279_vm1, %v2278_v36 }
 0x2a8   :  { %2043 = vmatprep.subr.mxu0 %v2278_v36 }
 0x2aa   :  { %v862_v50 = vpop.permute.xlu1 %861  ;;  %2036 = vmatmul.mubr.msk.f32.vlgmr.msra.gmra.mrb[4].mxu0 %vm180_vm2, %v689_v47  ;;  %v1200_v52 = vpop.permute.xlu0 %1199 }
 0x2ab   :  { %2044 = vmatpush3.xpose.msk.msra.mxu0 %vm180_vm2, %v862_v50  ;;  %2045 = vmatprep.mubr.msk.f32.mxu0 %vm2279_vm1, %v2278_v36 }
 0x2ac   :  { %2053 = vmatprep.subr.mxu0 %v2278_v36 }
 0x2ae   :  { %v1027_v51 = vpop.permute.xlu1 %1026  ;;  %2046 = vmatmul.mubr.msk.f32.vlgmr.msra.gmra.mrb[6].mxu0 %vm180_vm2, %v2393_v41  ;;  %v1371_v54 = vpop.permute.xlu0 %1370 }
 0x2af   :  { %2054 = vmatpush3.xpose.msk.msra.mxu0 %vm180_vm2, %v1029_v49  ;;  %2055 = vmatprep.mubr.msk.f32.mxu0 %vm2279_vm1, %v2278_v36 }
 0x2b0   :  { %2063 = vmatprep.subr.mxu0 %v2278_v36 }
 0x2b2   :  { %2056 = vmatmul.mubr.msk.f32.vlgmr.msra.gmra.mrb[8].mxu0 %vm180_vm2, %v1027_v51  ;;  %v1198_v53 = vpop.permute.xlu1 %1197 }
 0x2b3   :  { %2064 = vmatpush3.xpose.msk.msra.mxu0 %vm180_vm2, %v1200_v52  ;;  %2065 = vmatprep.mubr.msk.f32.mxu0 %vm2279_vm1, %v2278_v36 }
 0x2b4   :  { %2073 = vmatprep.subr.mxu0 %v2278_v36 }
 0x2b6   :  { %2066 = vmatmul.mubr.msk.f32.vlgmr.msra.gmra.mrb[10].mxu0 %vm180_vm2, %v1198_v53  ;;  %v1369_v55 = vpop.permute.xlu1 %1368 }
 0x2b7   :  { %2074 = vmatpush3.xpose.msk.msra.mxu0 %vm180_vm2, %v1371_v54  ;;  %2075 = vmatprep.mubr.msk.f32.mxu0 %vm2279_vm1, %v2278_v36 }
 0x2ba   :  { %2076 = vmatmul.mubr.msk.f32.vlgmr.msra.gmra.mrb[12].mxu0 %vm180_vm2, %v1369_v55 }
 0x371   :  { %v251_v56 = vpop.f32.mrb[2].mxu1 }
 0x372   :  { %v255_v57 = vmul.f32 0.35355338, %v251_v56  ;;  %v2007_v58 = vpop.f32.mrb[3].mxu1  ;;  %v418_v59 = vpop.f32.mrb[0].mxu0 }
 0x373   :  { %v422_v60 = vmul.f32 0.35355338, %v418_v59  ;;  %v2017_v61 = vpop.f32.mrb[1].mxu0 }
 0x374   :  { %v256_v62 = vsel %vm180_vm2, %v255_v57, -inf }
 0x375   :  { %257 = vmax.xlane.f32.xlu0 %v256_v62  ;;  %v423_v63 = vsel %vm180_vm2, %v422_v60, -inf }
 0x376   :  { %424 = vmax.xlane.f32.xlu1 %v423_v63 }
 0x379   :  { %v590_v2 = vpop.f32.mrb[2].mxu0 }
 0x37a   :  { %v2444_v3 = vmul.f32 0.35355338, %v590_v2  ;;  %v2027_v4 = vpop.f32.mrb[3].mxu0 }
 0x37c   :  { %v595_v5 = vsel %vm180_vm2, %v2444_v3, -inf }
 0x37d   :  { %596 = vmax.xlane.f32.xlu0 %v595_v5  ;;  %v762_v6 = vpop.f32.mrb[4].mxu0 }
 0x37e   :  { %v766_v7 = vmul.f32 0.35355338, %v762_v6  ;;  %v2037_v8 = vpop.f32.mrb[5].mxu0 }
 0x380   :  { %v767_v9 = vsel %vm180_vm2, %v766_v7, -inf }
 0x381   :  { %768 = vmax.xlane.f32.xlu0 %v767_v9  ;;  %v933_v10 = vpop.f32.mrb[6].mxu0 }
 0x382   :  { %v937_v11 = vmul.f32 0.35355338, %v933_v10  ;;  %v2047_v12 = vpop.f32.mrb[7].mxu0 }
 0x384   :  { %v938_v13 = vsel %vm180_vm2, %v937_v11, -inf }
 0x385   :  { %939 = vmax.xlane.f32.xlu0 %v938_v13  ;;  %v1100_v14 = vpop.f32.mrb[8].mxu0 }
 0x386   :  { %v1104_v15 = vmul.f32 0.35355338, %v1100_v14  ;;  %v2057_v16 = vpop.f32.mrb[9].mxu0 }
 0x388   :  { %v1105_v17 = vsel %vm180_vm2, %v1104_v15, -inf }
 0x389   :  { %1106 = vmax.xlane.f32.xlu1 %v1105_v17  ;;  %v1271_v18 = vpop.f32.mrb[10].mxu0 }
 0x38a   :  { %v1275_v19 = vmul.f32 0.35355338, %v1271_v18  ;;  %v2067_v20 = vpop.f32.mrb[11].mxu0 }
 0x38c   :  { %v1276_v21 = vsel %vm180_vm2, %v1275_v19, -inf }
 0x38d   :  { %1277 = vmax.xlane.f32.xlu0 %v1276_v21  ;;  %v1442_v22 = vpop.f32.mrb[12].mxu0 }
 0x38e   :  { %v2077_v23 = vpop.f32.mrb[13].mxu0  ;;  %v1446_v24 = vmul.f32 0.35355338, %v1442_v22 }
 0x390   :  { %v1447_v25 = vsel %vm180_vm2, %v1446_v24, -inf }
 0x39a   :  { %267 = vrot.lane.b32.xlu1 %v2385_v40, %s2287_s30 }
 0x3be   :  { %1448 = vmax.xlane.f32.xlu1 %v1447_v25 }
 0x3cf   :  { %606 = vrot.lane.b32.xlu1 %v2385_v40, %s2288_s9 }
 0x3d3   :  { %778 = vrot.lane.b32.xlu1 %v2385_v40, %s2289_s10 }
 0x3d7   :  { %949 = vrot.lane.b32.xlu1 %v2393_v41, %s2287_s30 }
 0x402   :  { %v258_v26 = vpop.xlane.xlu0 %257 }
 0x403   :  { %v259_v27 = vsub.f32 %v255_v57, %v258_v26  ;;  %v425_v28 = vpop.xlane.xlu1 %424 }
 0x404   :  { %v426_v29 = vsub.f32 %v422_v60, %v425_v28 }
 0x405   :  { %v260_v30 = vmul.f32 1.442695, %v259_v27 }
 0x406   :  { %v427_v31 = vmul.f32 1.442695, %v426_v29 }
 0x407   :  { %2187 = vpow2.f32 %v260_v30 }
 0x408   :  { %2189 = vpow2.f32 %v427_v31 }
 0x40a   :  { %v597_v32 = vpop.xlane.xlu0 %596 }
 0x40b   :  { %v598_v47 = vsub.f32 %v2444_v3, %v597_v32 }
 0x40d   :  { %v599_v49 = vmul.f32 1.442695, %v598_v47  ;;  %v1541_v47 = vld [vmem:[%s2625_s2] sm:$0xff] }
 0x40e   :  { %v769_v33 = vpop.xlane.xlu0 %768 }
 0x40f   :  { %v770_v34 = vsub.f32 %v766_v7, %v769_v33 }
 0x411   :  { %v2188_v35 = vpop.eup %2187  ;;  %v771_v37 = vmul.f32 1.442695, %v770_v34 }
 0x412   :  { %v2459_v38 = vpop.eup %2189  ;;  %v262_v39 = vsel %vm180_vm2, %v2188_v35, 0.0  ;;  %v940_v48 = vpop.xlane.xlu0 %939 }
 0x413   :  { %2191 = vpow2.f32 %v771_v37  ;;  %263 = vadd.xlane.f32.xlu0 %v262_v39  ;;  %v429_v42 = vsel %vm180_vm2, %v2459_v38, 0.0  ;;  %v941_v50 = vsub.f32 %v937_v11, %v940_v48  ;;  %v1542_v48 = vld [vmem:[%s2625_s2 + $0x8] sm:$0xff] }
 0x414   :  { %430 = vadd.xlane.f32.xlu1 %v429_v42  ;;  %2193 = vpow2.f32 %v599_v49  ;;  %v2132_v49 = vpack.c.bf16 %v1542_v48, %v1541_v47  ;;  %v1778_v47 = vld [vmem:[%s2627_s4 + $0x8] sm:$0xff] }
 0x415   :  { %v942_v52 = vmul.f32 1.442695, %v941_v50 }
 0x416   :  { %v1107_v43 = vpop.xlane.xlu1 %1106  ;;  %2133 = vmatprep.subr.bf16.mxu0 %v2132_v49 }
 0x417   :  { %2195 = vpow2.f32 %v942_v52  ;;  %v1108_v54 = vsub.f32 %v1104_v15, %v1107_v43  ;;  %v1544_v52 = vld [vmem:[%s2625_s2 + $0x18] sm:$0xff]  ;;  %2135 = vmatpush3.bf16.msra.mxu0 %v2132_v49  ;;  %v1779_v49 = vld [vmem:[%s2627_s4 + $0x10] sm:$0xff] }
 0x419   :  { %v1109_v56 = vmul.f32 1.442695, %v1108_v54 }
 0x41a   :  { %v268_v44 = vpop.permute.xlu1 %267  ;;  %v1278_v51 = vpop.xlane.xlu0 %1277 }
 0x41b   :  { %2009 = vmatpush3.msra.mxu1 %v268_v44  ;;  %v1279_v53 = vsub.f32 %v1275_v19, %v1278_v51  ;;  %v1543_v51 = vld [vmem:[%s2625_s2 + $0x10] sm:$0xff] }
 0x41c   :  { %2018 = vmatprep.subr.mxu1 %v2278_v36  ;;  %v2136_v54 = vpack.c.bf16 %v1544_v52, %v1543_v51  ;;  %v1781_v52 = vld [vmem:[%s2627_s4 + $0x20] sm:$0xff] }
 0x41d   :  { %v2465_v45 = vpop.eup %2191  ;;  %v1280_v55 = vmul.f32 1.442695, %v1279_v53 }
 0x41e   :  { %v773_v46 = vsel %vm180_vm2, %v2465_v45, 0.0  ;;  %v2194_v57 = vpop.eup %2193  ;;  %2137 = vmatprep.subr.bf16.mxu0 %v2136_v54 }
 0x41f   :  { %774 = vadd.xlane.f32.xlu1 %v773_v46  ;;  %2197 = vpow2.f32 %v1280_v55  ;;  %2139 = vmatpush3.bf16.msra.mxu0 %v2136_v54 }
 0x420   :  { %2199 = vpow2.f32 %v1109_v56 }
 0x421   :  { %v2196_v58 = vpop.eup %2195 }
 0x422   :  { %v944_v60 = vsel %vm180_vm2, %v2196_v58, 0.0 }
 0x429   :  { %434 = vrot.lane.b32.xlu0 %v2385_v40, %s2290_s0  ;;  %v601_v40 = vsel %vm180_vm2, %v2194_v57, 0.0  ;;  %v2474_v61 = vpop.eup %2197 }
 0x42a   :  { %v1282_v2 = vsel %vm180_vm2, %v2474_v61, 0.0  ;;  %v2200_v3 = vpop.eup %2199 }
 0x42b   :  { %v1111_v4 = vsel %vm180_vm2, %v2200_v3, 0.0 }
 0x430   :  { %1116 = vrot.lane.b32.xlu1 %v2393_v41, %s2290_s0 }
 0x448   :  { %602 = vadd.xlane.f32.xlu0 %v601_v40 }
 0x44b   :  { %v1449_v59 = vpop.xlane.xlu1 %1448 }
 0x44c   :  { %v1450_v62 = vsub.f32 %v1446_v24, %v1449_v59  ;;  %945 = vadd.xlane.f32.xlu0 %v944_v60 }
 0x44e   :  { %v1451_v63 = vmul.f32 1.442695, %v1450_v62 }
 0x44f   :  { %v607_v7 = vpop.permute.xlu1 %606 }
 0x450   :  { %2201 = vpow2.f32 %v1451_v63  ;;  %1283 = vadd.xlane.f32.xlu0 %v1282_v2 }
 0x453   :  { %v779_v8 = vpop.permute.xlu1 %778 }
 0x454   :  { %1112 = vadd.xlane.f32.xlu1 %v1111_v4 }
 0x457   :  { %v950_v9 = vpop.permute.xlu1 %949 }
 0x45a   :  { %v2479_v5 = vpop.eup %2201 }
 0x45b   :  { %v1453_v6 = vsel %vm180_vm2, %v2479_v5, 0.0 }
 0x45c   :  { %1454 = vadd.xlane.f32.xlu0 %v1453_v6  ;;  %v1921_v6 = vld [vmem:[%s2628_s5 + $0x6] ss:$0 sm:$0xff] }
 0x465   :  { %1458 = vrot.lane.b32.xlu1 %v2393_v41, %s2289_s10 }
 0x472   :  { %1287 = vrot.lane.b32.xlu0 %v2393_v41, %s2288_s9 }
 0x4a0   :  { %v264_v10 = vpop.xlane.xlu0 %263 }
 0x4a1   :  { %2203 = vrcp.f32 %v264_v10  ;;  %v431_v11 = vpop.xlane.xlu1 %430 }
 0x4a2   :  { %2205 = vrcp.f32 %v431_v11 }
 0x4a4   :  { %v435_v15 = vpop.permute.xlu0 %434 }
 0x4ab   :  { %v2204_v12 = vpop.eup %2203 }
 0x4ac   :  { %v266_v13 = vmul.f32 %v2204_v12, %v2188_v35  ;;  %v2206_v14 = vpop.eup %2205  ;;  %v775_v41 = vpop.xlane.xlu1 %774 }
 0x4ad   :  { %v433_v16 = vmul.f32 %v2206_v14, %v2459_v38 }
 0x4ae   :  { %2011 = vmatmul.mubr.msk.f32.vlgmr.msra.gmra.mrb[4].mxu1 %vm180_vm2, %v266_v13 }
 0x4af   :  { %2019 = vmatpush3.msra.mxu1 %v435_v15  ;;  %2020 = vmatprep.mubr.msk.f32.mxu1 %vm2279_vm1, %v2278_v36 }
 0x4b0   :  { %2028 = vmatprep.subr.mxu1 %v2278_v36  ;;  %v1117_v19 = vpop.permute.xlu1 %1116 }
 0x4b2   :  { %2021 = vmatmul.mubr.msk.f32.vlgmr.msra.gmra.mrb[6].mxu1 %vm180_vm2, %v433_v16 }
 0x4b3   :  { %2029 = vmatpush3.msra.mxu1 %v607_v7  ;;  %2030 = vmatprep.mubr.msk.f32.mxu1 %vm2279_vm1, %v2278_v36 }
 0x4b4   :  { %2038 = vmatprep.subr.mxu1 %v2278_v36 }
 0x4d5   :  { %v603_v17 = vpop.xlane.xlu0 %602 }
 0x4d6   :  { %2207 = vrcp.f32 %v603_v17 }
 0x4d7   :  { %2209 = vrcp.f32 %v775_v41 }
 0x4d9   :  { %v946_v18 = vpop.xlane.xlu0 %945 }
 0x4da   :  { %2211 = vrcp.f32 %v946_v18 }
 0x4dd   :  { %v1284_v22 = vpop.xlane.xlu0 %1283 }
 0x4e0   :  { %v2208_v20 = vpop.eup %2207 }
 0x4e1   :  { %v605_v21 = vmul.f32 %v2208_v20, %v2194_v57  ;;  %v1113_v23 = vpop.xlane.xlu1 %1112  ;;  %v2210_v24 = vpop.eup %2209 }
 0x4e2   :  { %2213 = vrcp.f32 %v1113_v23  ;;  %v777_v25 = vmul.f32 %v2210_v24, %v2465_v45  ;;  %v1671_v23 = vld [vmem:[%s2626_s3 + $0x8] sm:$0xff] }
 0x4e3   :  { %2031 = vmatmul.mubr.msk.f32.vlgmr.msra.gmra.mrb[8].mxu1 %vm180_vm2, %v605_v21  ;;  %2215 = vrcp.f32 %v1284_v22  ;;  %v1670_v22 = vld [vmem:[%s2626_s3] sm:$0xff] }
 0x4e4   :  { %2039 = vmatpush3.msra.mxu1 %v779_v8  ;;  %2040 = vmatprep.mubr.msk.f32.mxu1 %vm2279_vm1, %v2278_v36  ;;  %v2212_v26 = vpop.eup %2211  ;;  %v2140_v24 = vpack.c.bf16 %v1671_v23, %v1670_v22 }
 0x4e5   :  { %2048 = vmatprep.subr.mxu1 %v2278_v36  ;;  %v948_v27 = vmul.f32 %v2212_v26, %v2196_v58  ;;  %v1459_v34 = vpop.permute.xlu1 %1458  ;;  %v1673_v26 = vld [vmem:[%s2626_s3 + $0x18] sm:$0xff] }
 0x4e7   :  { %2041 = vmatmul.mubr.msk.f32.vlgmr.msra.gmra.mrb[10].mxu1 %vm180_vm2, %v777_v25  ;;  %v1672_v25 = vld [vmem:[%s2626_s3 + $0x10] sm:$0xff] }
 0x4e8   :  { %2049 = vmatpush3.msra.mxu1 %v950_v9  ;;  %2050 = vmatprep.mubr.msk.f32.mxu1 %vm2279_vm1, %v2278_v36 }
 0x4e9   :  { %v1455_v28 = vpop.xlane.xlu0 %1454  ;;  %2058 = vmatprep.subr.mxu1 %v2278_v36 }
 0x4ea   :  { %2217 = vrcp.f32 %v1455_v28 }
 0x4eb   :  { %2051 = vmatmul.mubr.msk.f32.vlgmr.msra.gmra.mrb[12].mxu1 %vm180_vm2, %v948_v27  ;;  %v2144_v27 = vpack.c.bf16 %v1673_v26, %v1672_v25 }
 0x4ec   :  { %v2214_v29 = vpop.eup %2213  ;;  %2059 = vmatpush3.msra.mxu1 %v1117_v19  ;;  %2060 = vmatprep.mubr.msk.f32.mxu1 %vm2279_vm1, %v2278_v36 }
 0x4ed   :  { %v1115_v30 = vmul.f32 %v2214_v29, %v2200_v3  ;;  %v1288_v31 = vpop.permute.xlu0 %1287  ;;  %2068 = vmatprep.subr.mxu1 %v2278_v36  ;;  %v2216_v32 = vpop.eup %2215 }
 0x4ee   :  { %v1286_v33 = vmul.f32 %v2216_v32, %v2474_v61 }
 0x4ef   :  { %2061 = vmatmul.mubr.msk.f32.vlgmr.msra.gmra.mrb[14].mxu1 %vm180_vm2, %v1115_v30 }
 0x4f0   :  { %2069 = vmatpush3.msra.mxu1 %v1288_v31  ;;  %2070 = vmatprep.mubr.msk.f32.mxu1 %vm2279_vm1, %v2278_v36 }
 0x4f1   :  { %2078 = vmatprep.subr.mxu1 %v2278_v36 }
 0x4f3   :  { %2071 = vmatmul.mubr.msk.f32.vlgmr.msra.gmra.mrb[16].mxu1 %vm180_vm2, %v1286_v33 }
 0x4f4   :  { %v2218_v35 = vpop.eup %2217  ;;  %2079 = vmatpush3.msra.mxu1 %v1459_v34  ;;  %2080 = vmatprep.mubr.msk.f32.mxu1 %vm2279_vm1, %v2278_v36 }
 0x4f5   :  { %v1457_v37 = vmul.f32 %v2218_v35, %v2479_v5  ;;  %2141 = vmatprep.subr.bf16.mxu1 %v2140_v24  ;;  %v1924_v35 = vld [vmem:[%s2628_s5 + $0x4] ss:$0 sm:$0xff] }
 0x4f7   :  { %2081 = vmatmul.mubr.msk.f32.vlgmr.msra.gmra.mrb[18].mxu1 %vm180_vm2, %v1457_v37 }
 0x4f8   :  { %2143 = vmatpush3.bf16.msra.mxu1 %v2140_v24 }
 0x4f9   :  { %2145 = vmatprep.subr.bf16.mxu1 %v2144_v27 }
 0x4fc   :  { %2147 = vmatpush3.bf16.msra.mxu1 %v2144_v27 }
 0x581   :  { %v339_v38 = vpop.f32.mrb[4].mxu1 }
 0x582   :  { %343 = vst.msk [vmem:[#allocation2] sm:$0xff] %vm180_vm2, %v339_v38  ;;  %v2012_v39 = vpop.f32.mrb[5].mxu1  ;;  %v1925_v38 = vld [vmem:[%s2628_s5 + $0x5] ss:$0 sm:$0xff] }
 0x585   :  { %v506_v42 = vpop.f32.mrb[6].mxu1 }
 0x586   :  { %511 = vrot.lane.b32.xlu0 %v506_v42, %s2277_s8  ;;  %v2022_v43 = vpop.f32.mrb[7].mxu1 }
 0x5b6   :  { %v678_v44 = vpop.f32.mrb[8].mxu1 }
 0x5b7   :  { %683 = vrot.lane.b32.xlu1 %v678_v44, %s2291_s11  ;;  %v2032_v45 = vpop.f32.mrb[9].mxu1 }
 0x5ba   :  { %v850_v46 = vpop.f32.mrb[10].mxu1 }
 0x5bb   :  { %855 = vrot.lane.b32.xlu1 %v850_v46, %s2292_s12  ;;  %v2042_v36 = vpop.f32.mrb[11].mxu1 }
 0x5bc   :  { %v1777_v36 = vld [vmem:[%s2627_s4] sm:$0xff] }
 0x5bd   :  { %v2148_v48 = vpack.c.bf16 %v1778_v47, %v1777_v36 }
 0x5be   :  { %v1021_v50 = vpop.f32.mrb[12].mxu1 }
 0x5bf   :  { %1025 = vst.msk [vmem:[#allocation2 + $0x8] sm:$0xff] %vm180_vm2, %v1021_v50  ;;  %v2052_v53 = vpop.f32.mrb[13].mxu1  ;;  %2149 = vmatprep.subr.bf16.mxu0 %v2148_v48  ;;  %v1780_v50 = vld [vmem:[%s2627_s4 + $0x18] sm:$0xff] }
 0x5c0   :  { %v2152_v51 = vpack.c.bf16 %v1780_v50, %v1779_v49  ;;  %v1782_v53 = vld [vmem:[%s2627_s4 + $0x28] sm:$0xff] }
 0x5c1   :  { %v2156_v54 = vpack.c.bf16 %v1782_v53, %v1781_v52 }
 0x5c2   :  { %v1188_v55 = vpop.f32.mrb[14].mxu1 }
 0x5c3   :  { %1193 = vrot.lane.b32.xlu0 %v1188_v55, %s2277_s8  ;;  %v2062_v56 = vpop.f32.mrb[15].mxu1  ;;  %v1783_v55 = vld [vmem:[%s2627_s4 + $0x30] sm:$0xff] }
 0x5c4   :  { %v1784_v56 = vld [vmem:[%s2627_s4 + $0x38] sm:$0xff] }
 0x5c6   :  { %v1359_v57 = vpop.f32.mrb[16].mxu1 }
 0x5c7   :  { %1364 = vrot.lane.b32.xlu0 %v1359_v57, %s2291_s11  ;;  %v2072_v40 = vpop.f32.mrb[17].mxu1  ;;  %v2160_v57 = vpack.c.bf16 %v1784_v56, %v1783_v55 }
 0x5c8   :  { %v1926_v40 = vld [vmem:[%s2628_s5 + $0x1] ss:$0 sm:$0xff] }
 0x5ca   :  { %v1530_v58 = vpop.f32.mrb[18].mxu1 }
 0x5cb   :  { %1535 = vrot.lane.b32.xlu1 %v1530_v58, %s2292_s12  ;;  %v2082_v59 = vpop.f32.mrb[19].mxu1 }
 0x5f8   :  { %v512_v60 = vpop.permute.xlu0 %511 }
 0x5f9   :  { %515 = vst.msk [vmem:[#allocation2] sm:$0xff] %vm514_vm3, %v512_v60 }
 0x629   :  { %v684_v61 = vpop.permute.xlu1 %683 }
 0x62a   :  { %687 = vst.msk [vmem:[#allocation2] sm:$0xff] %vm686_vm4, %v684_v61 }
 0x62d   :  { %v856_v62 = vpop.permute.xlu1 %855 }
 0x62e   :  { %859 = vst.msk [vmem:[#allocation2] sm:$0xff] %vm858_vm5, %v856_v62 }
 0x635   :  { %v1194_v63 = vpop.permute.xlu0 %1193  ;;  %v1539_v2 = vld [vmem:[#allocation2] sm:$0xff] }
 0x636   :  { %1196 = vst.msk [vmem:[#allocation2 + $0x8] sm:$0xff] %vm514_vm3, %v1194_v63  ;;  %2091 = vmatprep.mubr.msk.f32.mxu0 %vm48_vm0, %v1539_v2 }
 0x639   :  { %v1365_v3 = vpop.permute.xlu0 %1364 }
 0x63a   :  { %1367 = vst.msk [vmem:[#allocation2 + $0x8] sm:$0xff] %vm686_vm4, %v1365_v3 }
 0x63d   :  { %v1536_v4 = vpop.permute.xlu1 %1535 }
 0x63e   :  { %1538 = vst.msk [vmem:[#allocation2 + $0x8] sm:$0xff] %vm858_vm5, %v1536_v4 }
 0x645   :  { %v1540_v5 = vld [vmem:[#allocation2 + $0x8] sm:$0xff] }
 0x646   :  { %2092 = vmatmul.mubr.msk.f32.vlgmr.msra.gmra.mrb[14].mxu0 %vm48_vm0, %v1540_v5 }
 0x647   :  { %2151 = vmatpush3.bf16.msra.mxu0 %v2148_v48 }
 0x648   :  { %2153 = vmatprep.subr.bf16.mxu0 %v2152_v51 }
 0x64b   :  { %2155 = vmatpush3.bf16.msra.mxu0 %v2152_v51 }
 0x64c   :  { %2157 = vmatprep.subr.bf16.mxu0 %v2156_v54 }
 0x64f   :  { %2159 = vmatpush3.bf16.msra.mxu0 %v2156_v54 }
 0x650   :  { %2161 = vmatprep.subr.bf16.mxu0 %v2160_v57 }
 0x653   :  { %2163 = vmatpush3.bf16.msra.mxu0 %v2160_v57 }
 0x719   :  { %v2093_v7 = vpop.f32.mrb[14].mxu0 }
 0x71a   :  { %v1627_v8 = vadd.f32 %v2093_v7, %v1921_v6  ;;  %v1621_v9 = vpop.f32.mrb[15].mxu0 }
 0x71b   :  { %v1622_v10 = vadd.f32 %v1921_v6, %v1621_v9 }
 0x71c   :  { %v2541_v11 = vadd.f32 %v1627_v8, %v2346_v1 }
 0x71d   :  { %v2544_v12 = vadd.f32 %v1622_v10, %v2344_v0 }
 0x71e   :  { %v1635_v13 = vsel %vm48_vm0, %v2541_v11, 0.0 }
 0x71f   :  { %1636 = vadd.xlane.f32.xlu1 %v1635_v13  ;;  %v1632_v14 = vsel %vm48_vm0, %v2544_v12, 0.0 }
 0x720   :  { %1633 = vadd.xlane.f32.xlu0 %v1632_v14 }
 0x7ac   :  { %v1637_v15 = vpop.xlane.xlu1 %1636 }
 0x7ad   :  { %v1639_v16 = vmul.f32 0.03125, %v1637_v15  ;;  %v1634_v41 = vpop.xlane.xlu0 %1633 }
 0x7ae   :  { %v1638_v17 = vmul.f32 0.03125, %v1634_v41 }
 0x7af   :  { %v1641_v18 = vsub.f32 %v2541_v11, %v1639_v16 }
 0x7b0   :  { %v1640_v1 = vsub.f32 %v2544_v12, %v1638_v17 }
 0x7b1   :  { %v1643_v20 = vmul.f32 %v1641_v18, %v1641_v18 }
 0x7b2   :  { %v1642_v19 = vmul.f32 %v1640_v1, %v1640_v1 }
 0x7b3   :  { %v1647_v21 = vsel %vm48_vm0, %v1643_v20, 0.0 }
 0x7b4   :  { %v1644_v0 = vsel %vm48_vm0, %v1642_v19, 0.0 }
 0x7b5   :  { %1645 = vadd.xlane.f32.xlu0 %v1644_v0 }
 0x7b9   :  { %1648 = vadd.xlane.f32.xlu0 %v1647_v21 }
 0x842   :  { %v1646_v28 = vpop.xlane.xlu0 %1645 }
 0x843   :  { %v1650_v29 = vmul.f32 0.03125, %v1646_v28 }
 0x845   :  { %v1652_v30 = vadd.f32 1e-05, %v1650_v29 }
 0x846   :  { %v1649_v31 = vpop.xlane.xlu0 %1648 }
 0x847   :  { %2219 = vrsqrt.f32 %v1652_v30  ;;  %v1651_v32 = vmul.f32 0.03125, %v1649_v31 }
 0x849   :  { %v1653_v33 = vadd.f32 1e-05, %v1651_v32 }
 0x84b   :  { %2221 = vrsqrt.f32 %v1653_v33 }
 0x851   :  { %v2220_v34 = vpop.eup %2219 }
 0x852   :  { %v1656_v37 = vmul.f32 %v2220_v34, %v1640_v1  ;;  %v1929_v1 = vld [vmem:[%s2628_s5 + $0x7] ss:$0 sm:$0xff] }
 0x854   :  { %v1662_v39 = vmul.f32 %v1924_v35, %v1656_v37 }
 0x855   :  { %v2222_v42 = vpop.eup %2221 }
 0x856   :  { %v1657_v43 = vmul.f32 %v2222_v42, %v1641_v18  ;;  %v1668_v44 = vadd.f32 %v1925_v38, %v1662_v39 }
 0x858   :  { %v1663_v45 = vmul.f32 %v1924_v35, %v1657_v43  ;;  %2102 = vmatprep.mubr.msk.f32.mxu1 %vm48_vm0, %v1668_v44 }
 0x85a   :  { %v1669_v46 = vadd.f32 %v1925_v38, %v1663_v45 }
 0x85c   :  { %2103 = vmatmul.mubr.msk.f32.vlgmr.msra.gmra.mrb[20].mxu1 %vm48_vm0, %v1669_v46 }
 0x92f   :  { %v2104_v58 = vpop.f32.mrb[20].mxu1 }
 0x930   :  { %v1756_v59 = vadd.f32 %v2104_v58, %v1926_v40  ;;  %v1750_v60 = vpop.f32.mrb[21].mxu1 }
 0x931   :  { %v1751_v61 = vadd.f32 %v1926_v40, %v1750_v60 }
 0x932   :  { %v1760_v62 = vmul.f32 %v1756_v59, %v1756_v59 }
 0x933   :  { %v1759_v63 = vmul.f32 %v1751_v61, %v1751_v61 }
 0x934   :  { %v1762_v2 = vmul.f32 %v1760_v62, %v1756_v59 }
 0x935   :  { %v1761_v3 = vmul.f32 %v1759_v63, %v1751_v61 }
 0x936   :  { %v1764_v4 = vmul.f32 0.044715, %v1762_v2 }
 0x937   :  { %v1763_v5 = vmul.f32 0.044715, %v1761_v3 }
 0x938   :  { %v1766_v6 = vadd.f32 %v1764_v4, %v1756_v59 }
 0x939   :  { %v1765_v7 = vadd.f32 %v1763_v5, %v1751_v61 }
 0x93a   :  { %v1768_v8 = vmul.f32 0.7978846, %v1766_v6 }
 0x93b   :  { %v1767_v9 = vmul.f32 0.7978846, %v1765_v7 }
 0x93c   :  { %2223 = vtanh.f32 %v1768_v8 }
 0x93d   :  { %2225 = vtanh.f32 %v1767_v9 }
 0x946   :  { %v2224_v10 = vpop.eup %2223 }
 0x947   :  { %v2226_v13 = vpop.eup %2225  ;;  %v1772_v14 = vadd.f32 1.0, %v2224_v10 }
 0x948   :  { %v1771_v15 = vadd.f32 1.0, %v2226_v13 }
 0x949   :  { %v1774_v16 = vmul.f32 0.5, %v1772_v14 }
 0x94a   :  { %v1773_v41 = vmul.f32 0.5, %v1771_v15 }
 0x94b   :  { %v1776_v18 = vmul.f32 %v1774_v16, %v1756_v59 }
 0x94c   :  { %v1775_v17 = vmul.f32 %v1773_v41, %v1751_v61 }
 0x94e   :  { %2121 = vmatprep.mubr.msk.f32.mxu0 %vm1789_vm6, %v1775_v17 }
 0x94f   :  { %2122 = vmatmul.mubr.msk.f32.vlgmr.msra.gmra.mrb[16].mxu0 %vm1789_vm6, %v1776_v18 }
 0xa22   :  { %v2123_v19 = vpop.f32.mrb[16].mxu0 }
 0xa23   :  { %v1868_v0 = vadd.f32 %v2123_v19, %v1929_v1  ;;  %v1862_v20 = vpop.f32.mrb[17].mxu0 }
 0xa24   :  { %v1863_v21 = vadd.f32 %v1929_v1, %v1862_v20 }
 0xa25   :  { %v1872_v22 = vadd.f32 %v1868_v0, %v2541_v11 }
 0xa26   :  { %v1871_v23 = vadd.f32 %v1863_v21, %v2544_v12 }
 0xa27   :  { %1874 = vst.msk [vmem:[#allocation6 + $0x8] sm:$0xff] %vm48_vm0, %v1872_v22 }
 0xa28   :  { %1873 = vst.msk [vmem:[#allocation6] sm:$0xff] %vm48_vm0, %v1871_v23 }
 0xa29   :  { %2260 = shalt.err (!%p2257_p12)
}
 0xa2a   :  { %s2261_s30 = scalar_lea.hbm %s2629_s6, 256 }
 0xa2b   :  { %p2262_p13 = scmp.ne.s32.totalorder %s2629_s6, %s2261_s30  ;;  %p2265_p0 = scmp.lt.u32.totalorder %s2261_s30, %s2629_s6 }
 0xa2d   :  { %p2267_p1 = pnand %p2265_p0, %p2262_p13 }
 0xa2f   :  { %2270 = shalt.err (!%p2267_p1)
}
 0xa30   :  { %1886 = dma.vmem_to_hbm [thread:$0]  %s1881_s27, 256, %s2629_s6, [#allocation5], %s2276_s7, %s2276_s7, %s2277_s8  }
 0xa31   :  { %2273 = dma.done.wait [#allocation5], 256  }
 0xa32   :  { %2274 = vsyncadd [#allocation5], 4294967040 }
 0xa33   :  { %1890 = vsyncpa [#allocation4], 1 }
 0xa34   :  { %1891 = vsyncpa [#allocation5], 1 }

</bundles_post_ra>
